<compile_context>
chip_gen: v7x
topology: tpu7x:2x2x1
jax: 0.10.0
libtpu: 0.0.40
codegen_flags: <defaults>
</compile_context>

<pallas_src>
import functools

import jax
import jax.numpy as jnp
from jax.experimental import pallas as pl
from jax.experimental.pallas import tpu as pltpu


def _hyper_chattn_kernel(
    x_ref,      # (1, C_pad, HW_pad)  input slab for this batch element
    mod_ref,    # (1, C_pad, 1)       hypernet embedding column (f32)
    w1_ref,     # (Chid_pad, C_pad)   conv1 1x1 weight
    b1_ref,     # (Chid_pad, 1)       conv1 bias
    w2_ref,     # (C_pad, Chid_pad)   conv2 1x1 weight
    b2_ref,     # (C_pad, 1)          conv2 bias
    o_ref,      # (1, C_pad, HW_pad)  output slab
    *,
    hw_true,    # static: true H*W (avg divisor / max mask)
):
    x = x_ref[0]                                   # (C_pad, HW_pad), native dtype
    c_pad, hw_pad = x.shape

    # --- adaptive avg pool (lane reduction, f32 accumulation, true-HW divisor) ---
    sum_x = jnp.sum(x, axis=-1, keepdims=True, dtype=jnp.float32)    # (C_pad, 1)
    avg_p = sum_x * (1.0 / hw_true)

    # --- adaptive max pool (mask zero-padded lanes; static branch) ---
    if hw_pad > hw_true:
        col = jax.lax.broadcasted_iota(jnp.int32, (c_pad, hw_pad), 1)
        neg = jnp.asarray(jnp.finfo(x.dtype).min, x.dtype)
        x_for_max = jnp.where(col < hw_true, x, neg)
    else:
        x_for_max = x
    max_p = jnp.max(x_for_max, axis=-1, keepdims=True).astype(jnp.float32)  # (C_pad, 1)

    mod_p = mod_ref[0].astype(jnp.float32)                                  # (C_pad, 1)

    # --- fused shared MLP: conv1 on [avg | max | mod] at once, ELU, then one conv2 ---
    pooled = jnp.concatenate([avg_p, max_p, mod_p], axis=-1)                # (C_pad, 3)
    y = jnp.dot(w1_ref[...], pooled, preferred_element_type=jnp.float32)    # (Chid_pad, 3)
    y = y + b1_ref[...]
    y = jnp.where(y > 0, y, jnp.exp(jnp.minimum(y, 0.0)) - 1.0)             # ELU(alpha=1)
    e = jnp.sum(y, axis=-1, keepdims=True)                                  # (Chid_pad, 1)
    attn = jnp.dot(w2_ref[...], e, preferred_element_type=jnp.float32)      # (C_pad, 1)
    attn = attn + 3.0 * b2_ref[...]                                         # conv2 bias x3

    gate = jax.nn.sigmoid(attn).astype(x.dtype)                             # (C_pad, 1)

    # --- channel-wise gate, broadcast over lanes; store in native dtype ---
    o_ref[0] = x * gate


def _round_up(n, m):
    return ((n + m - 1) // m) * m


def hyper_chattn2d(x, h, index, params):
    """x: (B, C, H, W)  h: (B, P)  index: (L,) one-hot."""
    B, C, H, W = x.shape
    HW = H * W
    dt = x.dtype
    c_hid = params["w1"].shape[0]

    C_pad = _round_up(C, 8)
    HW_pad = _round_up(HW, 128)
    Chid_pad = _round_up(c_hid, 8)

    # Flatten spatial and zero-pad to lane/sublane-friendly extents.
    x3 = x.reshape(B, C, HW)
    x3 = jnp.pad(x3, ((0, 0), (0, C_pad - C), (0, HW_pad - HW)))

    # Hypernet embedding (batch-only, HW-independent) computed once in the wrapper.
    mod = (h @ params["wp"].T + params["bp"][None, :]
           + index[None, :] @ params["wi"].T + params["bi"][None, :])       # (B, C)
    mod = jnp.pad(mod.astype(jnp.float32), ((0, 0), (0, C_pad - C)))[:, :, None]  # (B, C_pad, 1)

    # Weights as f32 column-vector-friendly shapes, zero-padded so padded
    # channels / hidden units contribute nothing.
    w1 = jnp.pad(params["w1"].astype(jnp.float32),
                 ((0, Chid_pad - c_hid), (0, C_pad - C)))                   # (Chid_pad, C_pad)
    b1 = jnp.pad(params["b1"].astype(jnp.float32), ((0, Chid_pad - c_hid),))[:, None]
    w2 = jnp.pad(params["w2"].astype(jnp.float32),
                 ((0, C_pad - C), (0, Chid_pad - c_hid)))                   # (C_pad, Chid_pad)
    b2 = jnp.pad(params["b2"].astype(jnp.float32), ((0, C_pad - C),))[:, None]

    block_bytes = C_pad * HW_pad * x3.dtype.itemsize
    # in + out, each double-buffered, plus headroom for the tiny resident operands.
    vmem_limit = int(min(112 * 2**20, max(16 * 2**20, 4 * block_bytes + 4 * 2**20)))

    cost = pl.CostEstimate(
        flops=int(3 * B * C * HW + B * 2 * 3 * 2 * C * c_hid),
        transcendentals=int(B * (3 * c_hid + C)),
        bytes_accessed=int(2 * B * C * HW * dt.itemsize),
    )

    kernel = functools.partial(_hyper_chattn_kernel, hw_true=HW)

    out3 = pl.pallas_call(
        kernel,
        out_shape=jax.ShapeDtypeStruct((B, C_pad, HW_pad), dt),
        grid_spec=pltpu.PrefetchScalarGridSpec(
            num_scalar_prefetch=0,
            grid=(B,),
            in_specs=[
                pl.BlockSpec((1, C_pad, HW_pad), lambda b: (b, 0, 0)),   # x (pipelined)
                pl.BlockSpec((1, C_pad, 1), lambda b: (b, 0, 0)),        # mod column
                pl.BlockSpec((Chid_pad, C_pad), lambda b: (0, 0)),       # w1 (resident)
                pl.BlockSpec((Chid_pad, 1), lambda b: (0, 0)),           # b1
                pl.BlockSpec((C_pad, Chid_pad), lambda b: (0, 0)),       # w2
                pl.BlockSpec((C_pad, 1), lambda b: (0, 0)),              # b2
            ],
            out_specs=pl.BlockSpec((1, C_pad, HW_pad), lambda b: (b, 0, 0)),
        ),
        compiler_params=pltpu.CompilerParams(
            dimension_semantics=("parallel",),
            vmem_limit_bytes=vmem_limit,
        ),
        cost_estimate=cost,
    )(x3, mod, w1, b1, w2, b2)

    return out3[:, :C, :HW].reshape(B, C, H, W)


def _xavier_normal(key, shape, gain=1.0):
    fan_out, fan_in = shape[0], shape[1]
    std = gain * (2.0 / (fan_in + fan_out)) ** 0.5
    return std * jax.random.normal(key, shape, dtype=jnp.float32)


def make_params(key, n_channels, reduction, n_params, n_layers):
    c_hid = n_channels // reduction
    ks = jax.random.split(key, 8)
    # conv1: (Chid, C, 1, 1) -> (Chid, C); conv2: (C, Chid, 1, 1) -> (C, Chid)
    w1 = _xavier_normal(ks[0], (c_hid, n_channels))
    w2 = _xavier_normal(ks[1], (n_channels, c_hid))
    # PyTorch default conv/linear bias init: U(-1/sqrt(fan_in), 1/sqrt(fan_in))
    b1 = jax.random.uniform(ks[2], (c_hid,), minval=-1.0, maxval=1.0) / (n_channels ** 0.5)
    b2 = jax.random.uniform(ks[3], (n_channels,), minval=-1.0, maxval=1.0) / (c_hid ** 0.5)
    # embedder linears, xavier_normal_ with gain 0.002
    wp = _xavier_normal(ks[4], (n_channels, n_params), gain=0.002)
    wi = _xavier_normal(ks[5], (n_channels, n_layers), gain=0.002)
    bp = jax.random.uniform(ks[6], (n_channels,), minval=-1.0, maxval=1.0) / (n_params ** 0.5)
    bi = jax.random.uniform(ks[7], (n_channels,), minval=-1.0, maxval=1.0) / (n_layers ** 0.5)
    return dict(w1=w1, b1=b1, w2=w2, b2=b2, wp=wp, bp=bp, wi=wi, bi=bi)


def _reference(x, h, index, p):
    """Pure-JAX reference of HyperChAttn2d.forward for verification."""
    def mlp(v):  # v: (B, C)
        y = v @ p["w1"].T + p["b1"][None, :]
        y = jnp.where(y > 0, y, jnp.exp(jnp.minimum(y, 0.0)) - 1.0)
        return y @ p["w2"].T + p["b2"][None, :]

    avg_p = jnp.mean(x, axis=(2, 3))
    max_p = jnp.max(x, axis=(2, 3))
    mod_p = (h @ p["wp"].T + p["bp"][None, :]
             + index[None, :] @ p["wi"].T + p["bi"][None, :])
    attn = mlp(avg_p) + mlp(max_p) + mlp(mod_p)
    gate = jax.nn.sigmoid(attn)
    return x * gate[:, :, None, None]


if __name__ == "__main__":
    # Small shapes; H=W=12 makes HW=144 (pads to 256) to exercise the masked
    # max-pool / lane-padding path, reduction=4 gives Chid=4 (pads to 8).
    B, C, H, W = 2, 16, 12, 12
    reduction = 4
    n_params, n_layers = 8, 3

    key = jax.random.PRNGKey(0)
    kx, kh, kp = jax.random.split(key, 3)
    x = jax.random.normal(kx, (B, C, H, W), dtype=jnp.float32)
    h = jax.random.normal(kh, (B, n_params), dtype=jnp.float32)
    index = jnp.zeros((n_layers,), dtype=jnp.float32).at[1].set(1.0)  # one-hot layer 1

    params = make_params(kp, C, reduction, n_params, n_layers)

    out = hyper_chattn2d(x, h, index, params)
    out = jax.block_until_ready(out)

    ref = _reference(x, h, index, params)
    assert out.shape == (B, C, H, W)
    assert jnp.allclose(out, ref, atol=1e-5, rtol=1e-4), "mismatch vs reference"

    print("KERNEL_OK")
</pallas_src>

<mosaic_0001>
module attributes {stable_mosaic.version = 11 : i64} {
  func.func @_hyper_chattn_kernel(%arg0: i32, %arg1: memref<1x16x256xf32, #tpu.memory_space<vmem>>, %arg2: memref<1x16x1xf32, #tpu.memory_space<vmem>>, %arg3: memref<8x16xf32, #tpu.memory_space<vmem>>, %arg4: memref<8x1xf32, #tpu.memory_space<vmem>>, %arg5: memref<16x8xf32, #tpu.memory_space<vmem>>, %arg6: memref<16x1xf32, #tpu.memory_space<vmem>>, %arg7: memref<1x16x256xf32, #tpu.memory_space<vmem>>) attributes {dimension_semantics = [#tpu.dimension_semantics<parallel>], iteration_bounds = array<i64: 2>, scalar_prefetch = 0 : i64, scratch_operands = 0 : i64, tpu.core_type = #tpu.core_type<tc>, window_params = [{transform_indices = @transform_0, window_bounds = array<i64: 1, 16, 256>}, {transform_indices = @transform_1, window_bounds = array<i64: 1, 16, 1>}, {pipeline_mode = #tpu.pipeline_mode<synchronous>, transform_indices = @transform_2, window_bounds = array<i64: 8, 16>}, {pipeline_mode = #tpu.pipeline_mode<synchronous>, transform_indices = @transform_3, window_bounds = array<i64: 8, 1>}, {pipeline_mode = #tpu.pipeline_mode<synchronous>, transform_indices = @transform_4, window_bounds = array<i64: 16, 8>}, {pipeline_mode = #tpu.pipeline_mode<synchronous>, transform_indices = @transform_5, window_bounds = array<i64: 16, 1>}, {transform_indices = @transform_6, window_bounds = array<i64: 1, 16, 256>}]} {
    %c0 = arith.constant 0 : index
    %c0_0 = arith.constant 0 : index
    %c0_1 = arith.constant 0 : index
    %0 = vector.load %arg1[%c0, %c0_0, %c0_1] : memref<1x16x256xf32, #tpu.memory_space<vmem>>, vector<1x16x256xf32>
    %1 = vector.shape_cast %0 : vector<1x16x256xf32> to vector<16x256xf32>
    %cst = arith.constant dense<0.000000e+00> : vector<16xf32>
    %2 = vector.multi_reduction <add>, %1, %cst [1] : vector<16x256xf32> to vector<16xf32>
    %3 = vector.shape_cast %2 : vector<16xf32> to vector<16x1xf32>
    %cst_2 = arith.constant 0.0069444445 : f32
    %4 = vector.broadcast %cst_2 : f32 to vector<16x1xf32>
    %5 = arith.mulf %3, %4 : vector<16x1xf32>
    %6 = tpu.iota {dimensions = array<i32: 1>} : vector<16x256xi32>
    %c144_i32 = arith.constant 144 : i32
    %7 = vector.broadcast %c144_i32 : i32 to vector<16x256xi32>
    %8 = arith.cmpi slt, %6, %7 : vector<16x256xi32>
    %cst_3 = arith.constant -3.40282347E+38 : f32
    %9 = vector.broadcast %cst_3 : f32 to vector<16x256xf32>
    %10 = arith.select %8, %1, %9 : vector<16x256xi1>, vector<16x256xf32>
    %cst_4 = arith.constant dense<0xFF800000> : vector<16xf32>
    %11 = vector.multi_reduction <maximumf>, %10, %cst_4 [1] : vector<16x256xf32> to vector<16xf32>
    %12 = vector.shape_cast %11 : vector<16xf32> to vector<16x1xf32>
    %c0_5 = arith.constant 0 : index
    %c0_6 = arith.constant 0 : index
    %c0_7 = arith.constant 0 : index
    %13 = vector.load %arg2[%c0_5, %c0_6, %c0_7] : memref<1x16x1xf32, #tpu.memory_space<vmem>>, vector<1x16x1xf32>
    %14 = vector.shape_cast %13 : vector<1x16x1xf32> to vector<16x1xf32>
    %15 = tpu.concatenate %5, %12, %14 in 1 : vector<16x1xf32>, vector<16x1xf32>, vector<16x1xf32> -> vector<16x3xf32>
    %c0_8 = arith.constant 0 : index
    %c0_9 = arith.constant 0 : index
    %16 = vector.load %arg3[%c0_8, %c0_9] : memref<8x16xf32, #tpu.memory_space<vmem>>, vector<8x16xf32>
    %cst_10 = arith.constant dense<0.000000e+00> : vector<8x3xf32>
    %17 = tpu.matmul %16, %15, %cst_10 {dimension_numbers = #tpu.dot_dimension_numbers<[1], [0], [0], [1], [0, 0, 1, 1], [], []>} : vector<8x16xf32>, vector<16x3xf32>, vector<8x3xf32> -> vector<8x3xf32>
    %c0_11 = arith.constant 0 : index
    %c0_12 = arith.constant 0 : index
    %18 = vector.load %arg4[%c0_11, %c0_12] : memref<8x1xf32, #tpu.memory_space<vmem>>, vector<8x1xf32>
    %19 = vector.broadcast %18 : vector<8x1xf32> to vector<8x3xf32>
    %20 = arith.addf %17, %19 : vector<8x3xf32>
    %cst_13 = arith.constant 0.000000e+00 : f32
    %21 = vector.broadcast %cst_13 : f32 to vector<8x3xf32>
    %22 = arith.cmpf ogt, %20, %21 : vector<8x3xf32>
    %cst_14 = arith.constant 0.000000e+00 : f32
    %23 = vector.broadcast %cst_14 : f32 to vector<8x3xf32>
    %24 = arith.minimumf %20, %23 : vector<8x3xf32>
    %25 = math.exp %24 : vector<8x3xf32>
    %cst_15 = arith.constant 1.000000e+00 : f32
    %26 = vector.broadcast %cst_15 : f32 to vector<8x3xf32>
    %27 = arith.subf %25, %26 : vector<8x3xf32>
    %28 = arith.select %22, %20, %27 : vector<8x3xi1>, vector<8x3xf32>
    %cst_16 = arith.constant dense<0.000000e+00> : vector<8xf32>
    %29 = vector.multi_reduction <add>, %28, %cst_16 [1] : vector<8x3xf32> to vector<8xf32>
    %30 = vector.shape_cast %29 : vector<8xf32> to vector<8x1xf32>
    %c0_17 = arith.constant 0 : index
    %c0_18 = arith.constant 0 : index
    %31 = vector.load %arg5[%c0_17, %c0_18] : memref<16x8xf32, #tpu.memory_space<vmem>>, vector<16x8xf32>
    %cst_19 = arith.constant dense<0.000000e+00> : vector<16x1xf32>
    %32 = tpu.matmul %31, %30, %cst_19 {dimension_numbers = #tpu.dot_dimension_numbers<[1], [0], [0], [1], [0, 0, 1, 1], [], []>} : vector<16x8xf32>, vector<8x1xf32>, vector<16x1xf32> -> vector<16x1xf32>
    %c0_20 = arith.constant 0 : index
    %c0_21 = arith.constant 0 : index
    %33 = vector.load %arg6[%c0_20, %c0_21] : memref<16x1xf32, #tpu.memory_space<vmem>>, vector<16x1xf32>
    %cst_22 = arith.constant 3.000000e+00 : f32
    %34 = vector.broadcast %cst_22 : f32 to vector<16x1xf32>
    %35 = arith.mulf %34, %33 : vector<16x1xf32>
    %36 = arith.addf %32, %35 : vector<16x1xf32>
    %37 = arith.negf %36 : vector<16x1xf32>
    %38 = math.exp %37 : vector<16x1xf32>
    %cst_23 = arith.constant 1.000000e+00 : f32
    %39 = vector.broadcast %cst_23 : f32 to vector<16x1xf32>
    %40 = arith.addf %39, %38 : vector<16x1xf32>
    %41 = arith.divf %39, %40 : vector<16x1xf32>
    %42 = vector.broadcast %41 : vector<16x1xf32> to vector<16x256xf32>
    %43 = arith.mulf %1, %42 : vector<16x256xf32>
    %c0_24 = arith.constant 0 : index
    %c0_25 = arith.constant 0 : index
    %c0_26 = arith.constant 0 : index
    %44 = vector.load %arg7[%c0_24, %c0_25, %c0_26] : memref<1x16x256xf32, #tpu.memory_space<vmem>>, vector<1x16x256xf32>
    %45 = vector.shape_cast %44 : vector<1x16x256xf32> to vector<16x256xf32>
    %46 = vector.shape_cast %43 : vector<16x256xf32> to vector<1x16x256xf32>
    tpu.vector_store %arg7[%c0_24, %c0_25, %c0_26], %46 {strides = array<i32>} : memref<1x16x256xf32, #tpu.memory_space<vmem>>, vector<1x16x256xf32>,
    return
  }
  func.func @transform_0(%arg0: i32) -> (i32, i32, i32) {
    %c0_i32 = arith.constant 0 : i32
    %c0_i32_0 = arith.constant 0 : i32
    %c0_i32_1 = arith.constant 0 : i32
    return %arg0, %c0_i32, %c0_i32_0 : i32, i32, i32
  }
  func.func @transform_1(%arg0: i32) -> (i32, i32, i32) {
    %c0_i32 = arith.constant 0 : i32
    %c0_i32_0 = arith.constant 0 : i32
    %c0_i32_1 = arith.constant 0 : i32
    return %arg0, %c0_i32, %c0_i32_0 : i32, i32, i32
  }
  func.func @transform_2(%arg0: i32) -> (i32, i32) {
    %c0_i32 = arith.constant 0 : i32
    %c0_i32_0 = arith.constant 0 : i32
    %c0_i32_1 = arith.constant 0 : i32
    return %c0_i32, %c0_i32_0 : i32, i32
  }
  func.func @transform_3(%arg0: i32) -> (i32, i32) {
    %c0_i32 = arith.constant 0 : i32
    %c0_i32_0 = arith.constant 0 : i32
    %c0_i32_1 = arith.constant 0 : i32
    return %c0_i32, %c0_i32_0 : i32, i32
  }
  func.func @transform_4(%arg0: i32) -> (i32, i32) {
    %c0_i32 = arith.constant 0 : i32
    %c0_i32_0 = arith.constant 0 : i32
    %c0_i32_1 = arith.constant 0 : i32
    return %c0_i32, %c0_i32_0 : i32, i32
  }
  func.func @transform_5(%arg0: i32) -> (i32, i32) {
    %c0_i32 = arith.constant 0 : i32
    %c0_i32_0 = arith.constant 0 : i32
    %c0_i32_1 = arith.constant 0 : i32
    return %c0_i32, %c0_i32_0 : i32, i32
  }
  func.func @transform_6(%arg0: i32) -> (i32, i32, i32) {
    %c0_i32 = arith.constant 0 : i32
    %c0_i32_0 = arith.constant 0 : i32
    %c0_i32_1 = arith.constant 0 : i32
    return %arg0, %c0_i32, %c0_i32_0 : i32, i32, i32
  }
}

</mosaic_0001>

<bundles_post_ra>
// kernel: tpu_custom_call.1
= control target key start
LH: loop header
LB: loop body
LE: loop exit
PB: predicated region body
PF: predicated region fallthrough
CT: control target
= control target key end

     0   :  { %11 = vsyncpa [#allocation3], 0  ;;  %s968_s0 = inlined_call_operand.vmem [shape: f32[2,16,256], index: 0, kind: input, shape index: {}]   ;;  %s969_s1 = inlined_call_operand.vmem [shape: f32[2,16,1], index: 1, kind: input, shape index: {}]   ;;  %s970_s2 = inlined_call_operand.vmem [shape: f32[8,16], index: 2, kind: input, shape index: {}]   ;;  %s971_s3 = inlined_call_operand.vmem [shape: f32[8,1], index: 3, kind: input, shape index: {}]   ;;  %s972_s4 = inlined_call_operand.vmem [shape: f32[16,8], index: 4, kind: input, shape index: {}]   ;;  %s973_s5 = inlined_call_operand.vmem [shape: f32[16,1], index: 5, kind: input, shape index: {}]   ;;  %s974_s6 = inlined_call_operand.hbm [shape: f32[2,16,256], index: 6, kind: output, shape index: {}]  }
   0x1   :  { %13 = vsyncpa [#allocation3 + $0x1], 0  ;;  %s824_s21 = smov 0   ;;  %s826_s22 = smov 0  }
   0x2   :  { %s828_s23 = smov 0   ;;  %s830_s24 = smov 0  }
   0x3 LB: > { %s845_s25 = sadd.s32 4294967295, %s779_s24   ;;  %s610_s26 = sadd.s32 4294967294, %s779_s24   ;;  %s779_s24 = sphi %s830_s24, %s980_s24   ;;  %s775_s23 = sphi %s828_s23, %s979_s23   ;;  %s771_s22 = sphi %s826_s22, %s978_s22   ;;  %s767_s21 = sphi %s824_s21, %s977_s21  }
   0x4   : > { %s849_s27 = sadd.s32 1, %s779_s24   ;;  %s162_s28 = sadd.s32 1, %s775_s23 }
   0x5   : > { %s159_s29 = ssub.s32 %s779_s24, %s849_s27  ;;  %p172_p0 = scmp.ne.s32.totalorder %s775_s23, %s771_s22 }
   0x6   : > { %p160_p1 = scmp.eq.s32.totalorder %s159_s29, 0  ;;  %p173_p2 = scmp.eq.s32.totalorder %s845_s25, 1 }
   0x7   : > { %p178_p3 = scmp.ne.s32.totalorder %s771_s22, %s767_s21  ;;  %p179_p4 = scmp.eq.s32.totalorder %s610_s26, 1 }
   0x8   : > { %s860_s30 = scalar_select %p160_p1, %s775_s23, %s162_s28  }
   0x9   : > { %p862_p5 = por %p173_p2, %p172_p0  ;;  %p866_p6 = por %p179_p4, %p178_p3 }
   0xa   : > { %p613_p7 = scmp.ge.s32.totalorder %s779_s24, 1  ;;  %p225_p8 = scmp.lt.s32.totalorder %s779_s24, 3 }
   0xc   : > { %p226_p9 = pnand %p613_p7, %p225_p8 }
   0xd   : > { %p260_p10 = scmp.lt.s32.totalorder (!%p226_p9), %s845_s25, 1  ;;  %v282_v0 = vlaneseq (!%p226_p9)  ;;  %v781_v16 = vmov (!%p226_p9), 0.0|0.0   ;;  %s782_s18 = smov (!%p226_p9), 2   ;;  %vm783_vm1 = vmmov (!%p226_p9), 0   ;;  %v784_v17 = vmov (!%p226_p9), 0.0   ;;  %v314_v18 = vld [vmem:[%s971_s3] sm:$0xff] (!%p226_p9) }
   0xe   : > { %229 = sbr.rel (%p226_p9) target bundleno = 953 (0x3b9), region = 44  ;;  %651 = vmatprep.subr.bf16.mxu0 (!%p226_p9), %v781_v16  ;;  %643 = vmatprep.mubr.msk.f32.mxu0 (!%p226_p9), %vm783_vm1, %v784_v17  ;;  %v785_v19 = vmov (!%p226_p9), 0   ;;  %vm307_vm2 = vcmask (!%p226_p9), 7168   ;;  %vm310_vm3 = vcmask (!%p226_p9), 15360   ;;  %v313_v34 = vld [vmem:[%s970_s2] sm:$0xff] (!%p226_p9)  ;;  %vm320_vm4 = vcmask (!%p226_p9), 130048  }
   0xf   : > { %v283_v1 = vand.u32 (!%p226_p9), 127, %v282_v0  ;;  %705 = vset.pattern.permute.xlu1 (!%p226_p9), %v785_v19  ;;  %706 = vset.pattern.permute.xlu0 (!%p226_p9), %v785_v19  ;;  %vm400_vm5 = vcmask (!%p226_p9), 23552   ;;  %v404_v45 = vld [vmem:[%s972_s4] sm:$0xff] (!%p226_p9)  ;;  %vm410_vm7 = vcmask (!%p226_p9), 64512   ;;  %v405_v47 = vld [vmem:[%s972_s4 + $0x8] sm:$0xff] (!%p226_p9)  ;;  %s257_s16 = sand.u32 (!%p226_p9), 1, %s771_s22  }
  0x10   : > { %648 = vmatprep.mubr.msk.f32.mxu1 (!%p226_p9), %vm410_vm7, %v404_v45  ;;  %v407_v48 = vld [vmem:[%s973_s5 + $0x8] sm:$0xff] (!%p226_p9)  ;;  %v406_v49 = vld [vmem:[%s973_s5] sm:$0xff] (!%p226_p9)  ;;  %s632_s20 = sshll.u32 (!%p226_p9), %s845_s25, 9 }
  0x11   : > { %v284_v2 = vadd.s32 (!%p226_p9), 128, %v283_v1  ;;  %v409_v50 = vmul.f32 (!%p226_p9), 3.0, %v407_v48  ;;  %v408_v51 = vmul.f32 (!%p226_p9), 3.0, %v406_v49  ;;  %s923_s29 = scalar_lea.hbm (!%p226_p9), %s974_s6, %s632_s20 }
  0x13   : > { %vm286_vm0 = vcmp.lt.s32.totalorder (!%p226_p9), %v284_v2, 144 }
  0x15   : > { %s261_s9 = scalar_select %p260_p10, %s845_s25, 1 }
  0x16   : > { %s927_s25 = scalar_lea.sflag [#allocation3], %s257_s16 }
  0x17   : > { %s630_s10 = sshll.u32 %s261_s9, 5  ;;  %s631_s14 = sshll.u32 %s261_s9, 4 }
  0x18   : > { %s264_s13 = scalar_lea.vmem %s968_s0, %s630_s10  ;;  %s269_s17 = scalar_lea.vmem %s969_s1, %s631_s14 }
  0x19   : > { %v877_v3 = vld [vmem:[%s264_s13] sm:$0xff]  ;;  %v879_v4 = vld [vmem:[%s264_s13 + $0x8] sm:$0xff]  ;;  %v881_v5 = vld [vmem:[%s264_s13 + $0x10] sm:$0xff]  ;;  %s786_s10 = smov [#allocation2]  }
  0x1a   : > { %v274_v6 = vadd.f32 %v879_v4, %v877_v3  ;;  %v288_v7 = vsel %vm286_vm0, %v879_v4, -3.4028235e+38  ;;  %v886_v8 = vld [vmem:[%s264_s13 + $0x18] sm:$0xff]  ;;  %v297_v13 = vld [vmem:[%s269_s17] sm:$0xff]  ;;  %v298_v14 = vld [vmem:[%s269_s17 + $0x8] sm:$0xff]  ;;  %s614_s17 = sshll.u32 %s257_s16, 5 }
  0x1b   : > { %v291_v9 = vmax.f32 %v877_v3, %v288_v7  ;;  %v290_v10 = vsel %vm286_vm0, %v886_v8, -3.4028235e+38  ;;  %v277_v11 = vadd.f32 %v886_v8, %v881_v5  ;;  %v700_v15 = vpack.i.bf16 %v298_v14, %v297_v13  ;;  %s721_s11 = sshll.u32 %s786_s10, 4  ;;  %s722_s11 = int_to_ptr.vmem [resolvable:$false] %s721_s11 }
  0x1c   : > { %275 = vadd.xlane.f32.xlu0 %v274_v6  ;;  %v294_v12 = vmax.f32 %v881_v5, %v290_v10  ;;  %s723_s12 = scalar_lea.vmem %s722_s11, 1024 }
  0x1d   : > { %292 = vmax.xlane.f32.xlu1 %v291_v9 }
  0x20   : > { %278 = vadd.xlane.f32.xlu0 %v277_v11 }
  0x21   : > { %295 = vmax.xlane.f32.xlu1 %v294_v12 }
  0x32   : > { %317 = vperm.xlu1 %705, %v314_v18  }
  0x36   : > { %701 = vrot.lane.b32.xlu0 %v700_v15, %s782_s18  ;;  %s259_s18 = scalar_lea.vmem [#allocation2], %s614_s17 }
  0x37   : > { %s536_s19 = sshll.u32 %s259_s18, 4  ;;  %s918_s19 = int_to_ptr.vmem [resolvable:$true] %s536_s19 }
  0x38   : > { %s717_s9 = scalar_lea.vmem %s918_s19, 512  ;;  %p724_p0 = scmp.lt.s32.totalorder %s918_s19, %s722_s11 }
  0x39   : > { %p718_p11 = scmp.ne.s32.totalorder %s918_s19, %s717_s9  ;;  %p725_p1 = scmp.lt.s32.totalorder %s723_s12, %s717_s9 }
  0x3b   : > { %p719_p12 = pnand %p718_p11, %p862_p5  ;;  %p726_p2 = por %p725_p1, %p724_p0 }
  0x3d   : > { %p720_p13 = pneg %p719_p12 }
  0x3f   : > { %p727_p3 = pnand %p726_p2, %p720_p13 }
  0xa9   : > { %v276_v20 = vpop.xlane.xlu0 %275 }
  0xaa   : > { %v293_v21 = vpop.xlane.xlu1 %292  ;;  %v280_v23 = vmul.f32 0.0069444445, %v276_v20 }
  0xac   : > { %v308_v29 = vsel %vm307_vm2, %v280_v23, %v293_v21 }
  0xad   : > { %v279_v22 = vpop.xlane.xlu0 %278 }
  0xae   : > { %v281_v24 = vmul.f32 0.0069444445, %v279_v22  ;;  %v296_v25 = vpop.xlane.xlu1 %295 }
  0xb0   : > { %v309_v30 = vsel %vm307_vm2, %v281_v24, %v296_v25 }
  0xb1   : > { %v702_v26 = vpop.permute.xlu0 %701 }
  0xb2   : > { %v704_v27 = vunpack.i.h.bf16 %v702_v26  ;;  %v703_v28 = vunpack.i.l.bf16 %v702_v26  ;;  %v318_v35 = vpop.permute.xlu1 %317 }
  0xb4   : > { %v311_v31 = vsel %vm310_vm3, %v308_v29, %v703_v28  ;;  %v312_v32 = vsel %vm310_vm3, %v309_v30, %v704_v27 }
  0xb5   : > { %v652_v33 = vpack.c.bf16 %v312_v32, %v311_v31 }
  0xb7   : > { %653 = vmatpush3.bf16.msra.mxu0 %v652_v33 }
  0xba   : > { %644 = vmatmul.mubr.msk.f32.vlgmr.msra.gmra.mrb[0].mxu0 %vm320_vm4, %v313_v34 }
 0x18d   : > { %v390_v36 = vpop.f32.mrb[0].mxu0 }
 0x18e   : > { %v391_v37 = vadd.f32 %v390_v36, %v318_v35  ;;  %v645_v38 = vpop.f32.mrb[1].mxu0 }
 0x190   : > { %v395_v39 = vmin.f32 %v391_v37, 0.0  ;;  %vm394_vm6 = vcmp.gt.f32.partialorder %v391_v37, 0.0 }
 0x192   : > { %v396_v40 = vmul.f32 1.442695, %v395_v39 }
 0x194   : > { %707 = vpow2.f32 %v396_v40 }
 0x19e   : > { %v708_v41 = vpop.eup %707 }
 0x19f   : > { %v620_v42 = vadd.f32 -1.0, %v708_v41 }
 0x1a1   : > { %v399_v43 = vsel %vm394_vm6, %v391_v37, %v620_v42 }
 0x1a2   : > { %v401_v44 = vsel %vm400_vm5, %v399_v43, 0.0 }
 0x1a3   : > { %402 = vadd.xlane.f32.xlu1 %v401_v44 }
 0x230   : > { %v403_v46 = vpop.xlane.xlu1 %402 }
 0x231   : > { %646 = vmatprep.subr.mxu1 %v403_v46 }
 0x232   : > { %647 = vmatpush3.msra.mxu1 %v403_v46 }
 0x233   : > { %649 = vmatmul.mubr.msk.f32.vlgmr.msra.gmra.mrb[0].mxu1 %vm410_vm7, %v405_v47 }
 0x306   : > { %v650_v52 = vpop.f32.mrb[0].mxu1 }
 0x307   : > { %v489_v53 = vadd.f32 %v650_v52, %v409_v50  ;;  %v483_v54 = vpop.f32.mrb[1].mxu1 }
 0x308   : > { %v484_v55 = vadd.f32 %v483_v54, %v408_v51 }
 0x309   : > { %v624_v56 = vmul.f32 -1.442695, %v489_v53 }
 0x30a   : > { %v623_v57 = vmul.f32 -1.442695, %v484_v55 }
 0x30b   : > { %709 = vpow2.f32 %v624_v56 }
 0x30c   : > { %711 = vpow2.f32 %v623_v57 }
 0x315   : > { %v710_v58 = vpop.eup %709 }
 0x316   : > { %v712_v59 = vpop.eup %711  ;;  %v499_v61 = vadd.f32 1.0, %v710_v58 }
 0x317   : > { %v498_v60 = vadd.f32 1.0, %v712_v59 }
 0x319   : > { %713 = vrcp.f32 %v498_v60 }
 0x31a   : > { %715 = vrcp.f32 %v499_v61 }
 0x323   : > { %v714_v62 = vpop.eup %713 }
 0x324   : > { %506 = vperm.xlu0 %706, %v714_v62   ;;  %v716_v63 = vpop.eup %715 }
 0x328   : > { %511 = vperm.xlu0 %706, %v716_v63  }
 0x3a3   : > { %v507_v0 = vpop.permute.xlu0 %506 }
 0x3a4   : > { %v514_v1 = vmul.f32 %v507_v0, %v877_v3  ;;  %v515_v2 = vmul.f32 %v507_v0, %v879_v4 }
 0x3a6   : > { %518 = vst [vmem:[%s259_s18] sm:$0xff] %v514_v1  ;;  %519 = vst [vmem:[%s259_s18 + $0x8] sm:$0xff] %v515_v2 }
 0x3a7   : > { %v512_v6 = vpop.permute.xlu0 %511 }
 0x3a8   : > { %v516_v3 = vmul.f32 %v512_v6, %v881_v5  ;;  %v517_v4 = vmul.f32 %v512_v6, %v886_v8 }
 0x3aa   : > { %520 = vst [vmem:[%s259_s18 + $0x10] sm:$0xff] %v516_v3  ;;  %521 = vst [vmem:[%s259_s18 + $0x18] sm:$0xff] %v517_v4 }
 0x3ab   : > { %730 = shalt.err (!%p727_p3)
}
 0x3ac   : > { %s731_s13 = scalar_lea.hbm %s923_s29, 512  ;;  %s735_s16 = scalar_lea.hbm %s974_s6, 1024 }
 0x3ad   : > { %p732_p4 = scmp.ne.s32.totalorder %s923_s29, %s731_s13  ;;  %p736_p9 = scmp.lt.u32.totalorder %s923_s29, %s974_s6 }
 0x3ae   : > { %p737_p10 = scmp.lt.u32.totalorder %s735_s16, %s731_s13  ;;  %p739_p12 = scmp.lt.u32.totalorder %s731_s13, %s923_s29 }
 0x3af   : > { %p733_p7 = pnand %p732_p4, %p862_p5 }
 0x3b0   : > { %p738_p11 = por %p737_p10, %p736_p9 }
 0x3b1   : > { %p734_p8 = pneg %p733_p7 }
 0x3b2   : > { %p740_p13 = por %p739_p12, %p738_p11 }
 0x3b4   : > { %p741_p0 = pnand %p740_p13, %p734_p8 }
 0x3b6   : > { %744 = shalt.err (!%p741_p0)
}
 0x3b7   : > { %s787_s20 = smov 256   ;;  %s788_s26 = smov 16  }
 0x3b8   : > { %654 = dma.vmem_to_hbm [thread:$0]  (%p862_p5), %s918_s19, 512, %s923_s29, %s927_s25, %s787_s20, %s787_s20, %s788_s26  }
 0x3b9 PF: > { %p660_p1 = scmp.ge.s32.totalorder %s779_s24, 2  ;;  %s551_s28 = sand.u32 1, %s767_s21  }
 0x3ba   : > { %s552_s9 = scalar_lea.sflag [#allocation3], %s551_s28 }
 0x3bb   : > { %p657_p2 = pnand %p660_p1, %p866_p6 }
 0x3bd   : > { %762 = dma.done.wait (!%p657_p2), %s552_s9, 512  }
 0x3be   : > { %764 = vsyncadd (!%p657_p2), %s552_s9, 4294966784  ;;  %p16_p3 = scmp.ge.s32.totalorder %s849_s27, 4   ;;  %s977_s21 = smov %s771_s22 }
 0x3bf   : > { %s978_s22 = smov %s775_s23  ;;  %s979_s23 = smov %s860_s30 }
 0x3c0   : > { %s980_s24 = smov %s849_s27  ;;  %18 = sbr.rel (!%p16_p3) target bundleno = 3 (0x3), region = 82 }
 0x3c7   :  { %557 = vsyncpa [#allocation3], 1 }
 0x3c8   :  { %559 = vsyncpa [#allocation3 + $0x1], 1 }

</bundles_post_ra>
